<compile_context>
chip_gen: v5e
topology: v5e:2x2
jax: 0.10.0
libtpu: 0.0.40
codegen_flags: <defaults>
</compile_context>

<pallas_src>
import jax
import jax.numpy as jnp
from jax import lax
from jax.experimental import pallas as pl
from jax.experimental.pallas import tpu as pltpu


def lama_pooling_kernel(x_ref, o_ref):
    # x_ref: (Bb, T, F) VMEM  -- block of batch elements
    # o_ref: (Bb, 4*F)  VMEM  -- lane-dense [last | avg | max | att]
    x = x_ref[...]                                   # (Bb, T, F)
    _, T, F = x.shape

    last = x[:, T - 1, :]                            # (Bb, F)  'last' pooling

    # Single time-axis sum over the full aligned block, then correct for the
    # dropped last step.  att (softmax pooling with attn == 1) reuses it.
    s_full = jnp.sum(x, axis=1)                      # (Bb, F)
    s = s_full - last                                # sum over first T-1 steps
    att = s                                          # softmax attn over singleton channel == 1
    avg = s * (1.0 / (T - 1))                        # mean over first T-1 steps

    # max over first T-1 steps: mask the last row with -inf, reduce full block.
    t_idx = lax.broadcasted_iota(jnp.int32, x.shape, 1)
    neg_inf = jnp.asarray(-jnp.inf, dtype=x.dtype)
    mx = jnp.max(jnp.where(t_idx < (T - 1), x, neg_inf), axis=1)   # (Bb, F)

    # Lane-dense output: four F-wide lane slices (matches view(B, 4*F) of the
    # torch.cat([last, avg, max, att], dim=1) layout).
    o_ref[:, 0 * F:1 * F] = last
    o_ref[:, 1 * F:2 * F] = avg
    o_ref[:, 2 * F:3 * F] = mx
    o_ref[:, 3 * F:4 * F] = att


def lama_pooling(features, conv_w=None, conv_b=None, *, block_b=None):
    """features: (B, T, F). conv_w/conv_b (Conv1d(F,1,1) params) are accepted
    for interface parity with the PyTorch module but are mathematically unused:
    the softmax over the conv's singleton output channel is identically 1.0,
    so the attention pooling reduces bit-exactly to a time sum.
    Returns (B, 4*F)."""
    del conv_w, conv_b
    B, T, F = features.shape
    itemsize = jnp.dtype(features.dtype).itemsize

    if block_b is None:
        # Size the batch block so the input slab is ~4 MiB (double-buffered
        # ~8 MiB) -> fits comfortably on v5e/v6e/v7x scoped VMEM defaults.
        target_bytes = 4 * 1024 * 1024
        block_b = max(1, min(B, target_bytes // max(1, T * F * itemsize)))

    grid_b = pl.cdiv(B, block_b)

    in_block_bytes = block_b * T * F * itemsize
    out_block_bytes = block_b * 4 * F * itemsize
    # Explicit VMEM budget: double-buffered in + out, with 2x headroom,
    # floored at 16 MiB and capped well under v7x's 64 MiB physical VMEM.
    vmem_limit = int(min(48 * 1024 * 1024,
                         max(16 * 1024 * 1024, 4 * (in_block_bytes + out_block_bytes))))

    out = pl.pallas_call(
        lama_pooling_kernel,
        out_shape=jax.ShapeDtypeStruct((B, 4 * F), features.dtype),
        grid_spec=pltpu.PrefetchScalarGridSpec(
            num_scalar_prefetch=0,
            grid=(grid_b,),
            in_specs=[
                pl.BlockSpec((block_b, T, F), lambda b: (b, 0, 0)),
            ],
            out_specs=pl.BlockSpec((block_b, 4 * F), lambda b: (b, 0)),
        ),
        compiler_params=pltpu.CompilerParams(
            dimension_semantics=("parallel",),
            vmem_limit_bytes=vmem_limit,
        ),
    )(features)
    return out


def lama_pooling_ref(x, conv_w, conv_b):
    """Pure-JAX reference mirroring the PyTorch forward."""
    last = x[:, -1:, :]
    y = x[:, :-1, :]
    avg = jnp.mean(y, axis=1, keepdims=True)
    mx = jnp.max(y, axis=1, keepdims=True)
    scores = jnp.einsum("btf,f->bt", y, conv_w.reshape(-1)) + conv_b.reshape(())
    # nn.Softmax(dim=1) acts on the conv's singleton output-channel dim -> all ones.
    attn = jnp.ones_like(scores)
    att = jnp.sum(attn[..., None] * y, axis=1, keepdims=True)
    return jnp.concatenate([last, avg, mx, att], axis=1).reshape(x.shape[0], -1)


if __name__ == "__main__":
    key = jax.random.PRNGKey(0)
    kx, kw, kb = jax.random.split(key, 3)
    B, T, F = 2, 8, 32

    x = jax.random.normal(kx, (B, T, F), dtype=jnp.float32)
    # Synthetic Conv1d(F, 1, kernel_size=1, bias=True) params (weights cancel
    # in the forward because softmax over the singleton channel is 1.0).
    conv_w = (jax.random.uniform(kw, (1, F, 1), dtype=jnp.float32) - 0.5) * 0.1
    conv_b = (jax.random.uniform(kb, (1,), dtype=jnp.float32) - 0.5) * 0.1

    out = jax.block_until_ready(lama_pooling(x, conv_w, conv_b))
    ref = lama_pooling_ref(x, conv_w, conv_b)

    assert out.shape == (B, 4 * F), out.shape
    assert jnp.allclose(out, ref, atol=1e-5, rtol=1e-5), float(jnp.max(jnp.abs(out - ref)))
    print("KERNEL_OK")
</pallas_src>

<mosaic_0001>
module attributes {stable_mosaic.version = 11 : i64} {
  func.func @lama_pooling_kernel(%arg0: i32, %arg1: memref<2x8x32xf32, #tpu.memory_space<vmem>>, %arg2: memref<2x128xf32, #tpu.memory_space<vmem>>) attributes {dimension_semantics = [#tpu.dimension_semantics<parallel>], iteration_bounds = array<i64: 1>, scalar_prefetch = 0 : i64, scratch_operands = 0 : i64, tpu.core_type = #tpu.core_type<tc>, window_params = [{transform_indices = @transform_0, window_bounds = array<i64: 2, 8, 32>}, {transform_indices = @transform_1, window_bounds = array<i64: 2, 128>}]} {
    %c0 = arith.constant 0 : index
    %c0_0 = arith.constant 0 : index
    %c0_1 = arith.constant 0 : index
    %0 = vector.load %arg1[%c0, %c0_0, %c0_1] : memref<2x8x32xf32, #tpu.memory_space<vmem>>, vector<2x8x32xf32>
    %1 = vector.extract_strided_slice %0 {offsets = [0, 7, 0], sizes = [2, 1, 32], strides = [1, 1, 1]} : vector<2x8x32xf32> to vector<2x1x32xf32>
    %2 = vector.shape_cast %1 : vector<2x1x32xf32> to vector<2x32xf32>
    %cst = arith.constant dense<0.000000e+00> : vector<2x32xf32>
    %3 = vector.multi_reduction <add>, %0, %cst [1] : vector<2x8x32xf32> to vector<2x32xf32>
    %4 = arith.subf %3, %2 : vector<2x32xf32>
    %cst_2 = arith.constant 0.142857149 : f32
    %5 = vector.broadcast %cst_2 : f32 to vector<2x32xf32>
    %6 = arith.mulf %4, %5 : vector<2x32xf32>
    %7 = tpu.iota {dimensions = array<i32: 1>} : vector<2x8x32xi32>
    %c7_i32 = arith.constant 7 : i32
    %8 = vector.broadcast %c7_i32 : i32 to vector<2x8x32xi32>
    %9 = arith.cmpi slt, %7, %8 : vector<2x8x32xi32>
    %cst_3 = arith.constant 0xFF800000 : f32
    %10 = vector.broadcast %cst_3 : f32 to vector<2x8x32xf32>
    %11 = arith.select %9, %0, %10 : vector<2x8x32xi1>, vector<2x8x32xf32>
    %cst_4 = arith.constant dense<0xFF800000> : vector<2x32xf32>
    %12 = vector.multi_reduction <maximumf>, %11, %cst_4 [1] : vector<2x8x32xf32> to vector<2x32xf32>
    %c0_5 = arith.constant 0 : index
    %c0_6 = arith.constant 0 : index
    %13 = vector.load %arg2[%c0_5, %c0_6] : memref<2x128xf32, #tpu.memory_space<vmem>>, vector<2x32xf32>
    tpu.vector_store %arg2[%c0_5, %c0_6], %2 {strides = array<i32>} : memref<2x128xf32, #tpu.memory_space<vmem>>, vector<2x32xf32>,
    %c0_7 = arith.constant 0 : index
    %c32 = arith.constant 32 : index
    %14 = vector.load %arg2[%c0_7, %c32] : memref<2x128xf32, #tpu.memory_space<vmem>>, vector<2x32xf32>
    tpu.vector_store %arg2[%c0_7, %c32], %6 {strides = array<i32>} : memref<2x128xf32, #tpu.memory_space<vmem>>, vector<2x32xf32>,
    %c0_8 = arith.constant 0 : index
    %c64 = arith.constant 64 : index
    %15 = vector.load %arg2[%c0_8, %c64] : memref<2x128xf32, #tpu.memory_space<vmem>>, vector<2x32xf32>
    tpu.vector_store %arg2[%c0_8, %c64], %12 {strides = array<i32>} : memref<2x128xf32, #tpu.memory_space<vmem>>, vector<2x32xf32>,
    %c0_9 = arith.constant 0 : index
    %c96 = arith.constant 96 : index
    %16 = vector.load %arg2[%c0_9, %c96] : memref<2x128xf32, #tpu.memory_space<vmem>>, vector<2x32xf32>
    tpu.vector_store %arg2[%c0_9, %c96], %4 {strides = array<i32>} : memref<2x128xf32, #tpu.memory_space<vmem>>, vector<2x32xf32>,
    return
  }
  func.func @transform_0(%arg0: i32) -> (i32, i32, i32) {
    %c0_i32 = arith.constant 0 : i32
    %c0_i32_0 = arith.constant 0 : i32
    %c0_i32_1 = arith.constant 0 : i32
    return %arg0, %c0_i32, %c0_i32_0 : i32, i32, i32
  }
  func.func @transform_1(%arg0: i32) -> (i32, i32) {
    %c0_i32 = arith.constant 0 : i32
    %c0_i32_0 = arith.constant 0 : i32
    return %arg0, %c0_i32 : i32, i32
  }
}

</mosaic_0001>

<bundles_post_ra>
// kernel: tpu_custom_call.1
= control target key start
LH: loop header
LB: loop body
LE: loop exit
PB: predicated region body
PF: predicated region fallthrough
CT: control target
= control target key end

     0   :  { %6 = vsyncpa [#allocation3], 0  ;;  %s208_s0 = inlined_call_operand.hbm [shape: f32[2,8,32], index: 0, kind: input, shape index: {}]   ;;  %s209_s1 = inlined_call_operand.hbm [shape: f32[2,128], index: 1, kind: output, shape index: {}]  }
   0x1   :  { %7 = vsyncpa [#allocation4], 0  ;;  %s12_s8 = sshll.u32 %s208_s0, 4  ;;  %s185_s9 = smov [#allocation2]   ;;  %s13_s8 = int_to_ptr.hbm [resolvable:$true] %s12_s8 }
   0x2   :  { %s14_s10 = sshll.u32 %s185_s9, 4  ;;  %s186_s11 = smov 128   ;;  %s15_s10 = int_to_ptr.vmem [resolvable:$true] %s14_s10 }
   0x3   :  { %s187_s12 = smov 8  }
   0x4   :  { %20 = dma.hbm_to_vmem [thread:$0]  %s13_s8, 256, %s15_s10, [#allocation3], %s186_s11, %s186_s11, %s187_s12  }
   0x5   :  { %181 = dma.done.wait [#allocation3], 256  }
   0x6   :  { %182 = vsyncadd [#allocation3], 4294967040  ;;  %v46_v0 = vlaneseq  ;;  %vm27_vm0 = vcmask 261120   ;;  %vm70_vm2 = vcmask 261127   ;;  %v25_v2 = vld [vmem:[#allocation2] sm:$0xff]  ;;  %v26_v3 = vld [vmem:[#allocation2 + $0x8] sm:$0xff] }
   0x7   :  { %v28_v4 = vsel %vm27_vm0, %v25_v2, 0.0  ;;  %v35_v7 = vsel %vm27_vm0, %v26_v3, 0.0  ;;  %71 = vst.msk [vmem:[#allocation5 - $0x7] sm:$0x80] %vm70_vm2, %v25_v2  ;;  %vm89_vm3 = vcmask 1041409   ;;  %s188_s0 = smov 64  }
   0x8   :  { %v47_v1 = vshrl.u32 %v46_v0, 7  ;;  %v29_v8 = vrot.slane %v28_v4, 4  ;;  %v36_v11 = vrot.slane %v35_v7, 4  ;;  %s189_s13 = smov 32   ;;  %s190_s14 = smov 96   ;;  %v67_v41 = vrot.slane %v26_v3, 7 }
   0x9   :  { %vm72_vm4 = vcmask 253952   ;;  %vm83_vm5 = vcmask 523527   ;;  %vm85_vm6 = vcmask 516352   ;;  %vm94_vm7 = vcmask 779776   ;;  %s191_s15 = smov [#allocation5]   ;;  %s116_s19 = sshll.u32 %s209_s1, 4  ;;  %s117_s19 = int_to_ptr.hbm [resolvable:$true] %s116_s19 }
   0xa   :  { %vm48_vm1 = vcmp.lt.s32.totalorder %v47_v1, 7  ;;  %v30_v14 = vadd.f32 %v29_v8, %v28_v4  ;;  %v37_v15 = vadd.f32 %v36_v11, %v35_v7  ;;  %73 = vst.msk [vmem:[#allocation5 + $0x1] sm:$0x1] %vm72_vm4, %v67_v41  ;;  %s114_s16 = sshll.u32 %s191_s15, 4  ;;  %vm107_vm8 = vcmask 1041152   ;;  %s115_s16 = int_to_ptr.vmem [resolvable:$true] %s114_s16 }
   0xb   :  { %v49_v5 = vsel %vm48_vm1, %v25_v2, -inf  ;;  %v50_v6 = vsel %vm48_vm1, %v26_v3, -inf  ;;  %vm105_vm9 = vcmask 1048327  }
   0xc   :  { %v51_v9 = vsel %vm27_vm0, %v49_v5, -inf  ;;  %v58_v10 = vsel %vm27_vm0, %v50_v6, -inf  ;;  %v31_v18 = vrot.slane %v30_v14, 2  ;;  %v38_v19 = vrot.slane %v37_v15, 2 }
   0xd   :  { %v52_v12 = vrot.slane %v51_v9, 4  ;;  %v59_v13 = vrot.slane %v58_v10, 4 }
   0xe   :  { %v32_v22 = vadd.f32 %v31_v18, %v30_v14  ;;  %v39_v23 = vadd.f32 %v38_v19, %v37_v15 }
   0xf   :  { %v53_v16 = vmax.f32 %v51_v9, %v52_v12  ;;  %v60_v17 = vmax.f32 %v58_v10, %v59_v13 }
  0x10   :  { %v33_v26 = vrot.slane %v32_v22, 1  ;;  %v40_v27 = vrot.slane %v39_v23, 1 }
  0x11   :  { %v54_v20 = vrot.slane %v53_v16, 2  ;;  %v61_v21 = vrot.slane %v60_v17, 2 }
  0x12   :  { %v34_v30 = vadd.f32 %v33_v26, %v32_v22  ;;  %v41_v31 = vadd.f32 %v40_v27, %v39_v23 }
  0x13   :  { %v55_v24 = vmax.f32 %v53_v16, %v54_v20  ;;  %v62_v25 = vmax.f32 %v60_v17, %v61_v21 }
  0x14   :  { %v42_v34 = vsub.f32 %v34_v30, %v25_v2  ;;  %v43_v35 = vsub.f32 %v41_v31, %v26_v3 }
  0x15   :  { %v56_v28 = vrot.slane %v55_v24, 1  ;;  %v63_v29 = vrot.slane %v62_v25, 1 }
  0x16   :  { %v44_v37 = vmul.f32 0.14285715, %v42_v34  ;;  %v98_v38 = vrot.slane %v43_v35, 7  ;;  %v45_v39 = vmul.f32 0.14285715, %v43_v35 }
  0x17   :  { %v57_v32 = vmax.f32 %v55_v24, %v56_v28  ;;  %v64_v33 = vmax.f32 %v62_v25, %v63_v29 }
  0x18   :  { %77 = vrot.lane.b32.xlu0 %v44_v37, %s189_s13  ;;  %101 = vrot.lane.b32.xlu2 %v98_v38, %s190_s14  ;;  %v76_v40 = vrot.slane %v45_v39, 7 }
  0x19   :  { %v90_v36 = vsel %vm89_vm3, %v64_v33, %v57_v32 }
  0x1a   :  { %91 = vrot.lane.b32.xlu1 %v90_v36, %s188_s0 }
  0x20   :  { %79 = vrot.lane.b32.xlu0 %v76_v40, %s189_s13 }
  0x22   :  { %99 = vrot.lane.b32.xlu1 %v42_v34, %s190_s14 }
  0x72   :  { %v102_v45 = vpop.permute.xlu2 %101 }
  0x8a   :  { %v78_v43 = vpop.permute.xlu0 %77 }
  0x8b   :  { %84 = vst.msk [vmem:[#allocation5 - $0x7] sm:$0x80] %vm83_vm5, %v78_v43 }
  0x8c   :  { %v92_v42 = vpop.permute.xlu1 %91 }
  0x92   :  { %v80_v44 = vpop.permute.xlu0 %79 }
  0x93   :  { %86 = vst.msk [vmem:[#allocation5 + $0x1] sm:$0x1] %vm85_vm6, %v80_v44 }
  0x94   :  { %v100_v46 = vpop.permute.xlu1 %99  ;;  %95 = vst.msk [vmem:[#allocation5] sm:$0x3] %vm94_vm7, %v92_v42 }
  0x95   :  { %108 = vst.msk [vmem:[#allocation5 + $0x1] sm:$0x1] %vm107_vm8, %v102_v45 }
  0x96   :  { %106 = vst.msk [vmem:[#allocation5 - $0x7] sm:$0x80] %vm105_vm9, %v100_v46 }
  0x97   :  { %119 = dma.vmem_to_hbm [thread:$0]  %s115_s16, 32, %s117_s19, [#allocation4]  }
  0x98   :  { %183 = dma.done.wait [#allocation4], 32  }
  0x99   :  { %184 = vsyncadd [#allocation4], 4294967264 }
  0x9a   :  { %124 = vsyncpa [#allocation3], 1 }
  0x9b   :  { %125 = vsyncpa [#allocation4], 1 }

</bundles_post_ra>
